<compile_context>
chip_gen: v7x
topology: tpu7x:2x2x1
jax: 0.10.0
libtpu: 0.0.40
codegen_flags: <defaults>
</compile_context>

<pallas_src>
import functools

import jax
import jax.numpy as jnp
from jax import lax
from jax.experimental import pallas as pl
from jax.experimental.pallas import tpu as pltpu


_VMEM_LIMIT = 32 * 1024 * 1024  # tiles are small after the layout change


def _cdiv(a, b):
    return (a + b - 1) // b


def _round_up(a, b):
    return _cdiv(a, b) * b


# --------------------------------------------------------------------------
# Shared in-kernel helper: nearest codeword in the lane-dense layout.
#   x    : (D, block_t)  float32   (samples on lanes)
#   cb_t : (D, K)        float32   (codebook, transposed)
# returns (min_sq_dist (1, block_t), argmin_index (1, block_t) int32)
# --------------------------------------------------------------------------
def _nearest_codeword_T(x, cb_t):
    d, k = cb_t.shape
    bt = x.shape[1]

    if k <= 64:
        # K-unrolled VPU running min / argmin; everything stays 128-lane
        # dense and no (T, K) matrix is materialized.  Exact (x-c)^2 form,
        # so distances are non-negative by construction.
        ck = cb_t[:, 0:1]                                        # (D, 1)
        diff = x - ck
        mind = jnp.sum(diff * diff, axis=0, keepdims=True)       # (1, bt)
        argm = jnp.zeros((1, bt), jnp.int32)
        for kk in range(1, k):
            ck = cb_t[:, kk:kk + 1]
            diff = x - ck
            dk = jnp.sum(diff * diff, axis=0, keepdims=True)
            better = dk < mind                                   # first-occurrence ties
            mind = jnp.where(better, dk, mind)
            argm = jnp.where(better, jnp.int32(kk), argm)
        return mind, argm

    # MXU fallback for large K (still lane-dense: (K, bt) intermediates).
    x2 = jnp.sum(x * x, axis=0, keepdims=True)                   # (1, bt)
    c2 = jnp.transpose(jnp.sum(cb_t * cb_t, axis=0, keepdims=True))  # (K, 1)
    cx = lax.dot_general(cb_t, x, (((0,), (0,)), ((), ())),
                         preferred_element_type=jnp.float32)     # (K, bt)
    dist = x2 + c2 - 2.0 * cx
    mind = jnp.min(dist, axis=0, keepdims=True)
    iota_k = lax.broadcasted_iota(jnp.int32, dist.shape, 0)
    argm = jnp.min(jnp.where(dist <= mind, iota_k, jnp.int32(2 ** 30)),
                   axis=0, keepdims=True)
    return jnp.maximum(mind, 0.0), argm


# --------------------------------------------------------------------------
# Kernel 1: E-step statistics (per-cluster [sums | counts] and total squared
# error).  Used inside the EM iteration loop; no index output.
# Grid: (n_cores "parallel", tiles_per_core "arbitrary") with per-core
# resident output slabs.
# --------------------------------------------------------------------------
def _estep_stats_kernel(x_ref, cb_ref, sc_ref, dist_ref,
                        *, num_cols, padded_cols, tiles_per_core):
    i = pl.program_id(1)

    @pl.when(i == 0)
    def _():
        sc_ref[...] = jnp.zeros_like(sc_ref)
        dist_ref[...] = jnp.zeros_like(dist_ref)

    cb_t = cb_ref[...].astype(jnp.float32)           # (D, K)
    d, k = cb_t.shape
    x_aug = x_ref[...].astype(jnp.float32)           # (D+1, bt)  last row = 1
    x = x_aug[:d, :]                                 # (D, bt)
    bt = x.shape[1]

    mind, argm = _nearest_codeword_T(x, cb_t)        # (1, bt), (1, bt)

    iota_k = lax.broadcasted_iota(jnp.int32, (k, bt), 0)
    onehot = (iota_k == argm).astype(jnp.float32)    # (K, bt)
    mind = jnp.maximum(mind, 0.0)

    if num_cols != padded_cols:
        # In-kernel validity mask for padded columns.
        c = pl.program_id(0)
        cols = ((c * tiles_per_core + i) * bt
                + lax.broadcasted_iota(jnp.int32, (1, bt), 1))
        valid = (cols < num_cols).astype(jnp.float32)
        onehot = onehot * valid
        mind = mind * valid

    # [sums | counts] in one matmul: onehot (K, bt) . x_aug^T (bt, D+1).
    # Counts in f32 are exact up to 2^24 rows per cluster.
    sc_ref[...] += lax.dot_general(onehot, x_aug, (((1,), (1,)), ((), ())),
                                   preferred_element_type=jnp.float32)
    dist_ref[...] += jnp.sum(mind, keepdims=True)    # (1, 1)


def _lbg_estep_stats(x_aug, cb_t, *, num_rows, block_t):
    d_aug, t_pad = x_aug.shape
    d, k = cb_t.shape
    n_tiles = t_pad // block_t
    n_cores = 2 if (n_tiles >= 2 and n_tiles % 2 == 0) else 1
    tiles_per_core = n_tiles // n_cores

    kernel = functools.partial(_estep_stats_kernel, num_cols=num_rows,
                               padded_cols=t_pad,
                               tiles_per_core=tiles_per_core)
    return pl.pallas_call(
        kernel,
        out_shape=(
            jax.ShapeDtypeStruct((n_cores, k, d_aug), jnp.float32),  # [sums|counts]
            jax.ShapeDtypeStruct((n_cores, 1, 1), jnp.float32),      # sq. error
        ),
        grid_spec=pltpu.PrefetchScalarGridSpec(
            num_scalar_prefetch=0,
            grid=(n_cores, tiles_per_core),
            in_specs=[
                pl.BlockSpec((d_aug, block_t),
                             lambda c, i: (0, c * tiles_per_core + i)),
                pl.BlockSpec((d, k), lambda c, i: (0, 0)),
            ],
            out_specs=[
                pl.BlockSpec((None, k, d_aug), lambda c, i: (c, 0, 0)),
                pl.BlockSpec((None, 1, 1), lambda c, i: (c, 0, 0)),
            ],
        ),
        compiler_params=pltpu.CompilerParams(
            dimension_semantics=("parallel", "arbitrary"),
            vmem_limit_bytes=_VMEM_LIMIT),
    )(x_aug, cb_t)


# --------------------------------------------------------------------------
# Kernel 2: index-only E-step (runs once, only when return_indices=True).
# Lane-dense (1, T_pad) output.
# --------------------------------------------------------------------------
def _estep_indices_kernel(x_ref, cb_ref, idx_ref):
    cb_t = cb_ref[...].astype(jnp.float32)           # (D, K)
    d = cb_t.shape[0]
    x = x_ref[...][:d, :].astype(jnp.float32)        # (D, bt)
    _, argm = _nearest_codeword_T(x, cb_t)
    idx_ref[...] = argm.astype(jnp.int32)            # (1, bt)


def _lbg_estep_indices(x_aug, cb_t, *, block_t):
    d_aug, t_pad = x_aug.shape
    d, k = cb_t.shape
    return pl.pallas_call(
        _estep_indices_kernel,
        out_shape=jax.ShapeDtypeStruct((1, t_pad), jnp.int32),
        grid_spec=pltpu.PrefetchScalarGridSpec(
            num_scalar_prefetch=0,
            grid=(t_pad // block_t,),
            in_specs=[
                pl.BlockSpec((d_aug, block_t), lambda i: (0, i)),
                pl.BlockSpec((d, k), lambda i: (0, 0)),
            ],
            out_specs=pl.BlockSpec((1, block_t), lambda i: (0, i)),
        ),
        compiler_params=pltpu.CompilerParams(
            dimension_semantics=("parallel",),
            vmem_limit_bytes=_VMEM_LIMIT),
    )(x_aug, cb_t)


# --------------------------------------------------------------------------
# One LBG "generation": split codewords, then run the EM loop on device
# (lax.while_loop, convergence test + empty-cluster repair via lax.cond).
# Only log2(K) of these are dispatched from the host per forward().
# --------------------------------------------------------------------------
@functools.partial(
    jax.jit,
    static_argnames=("curr", "t", "block_t", "n_iter", "eps", "min_data", "pf"))
def _lbg_generation(x_aug, codebook, distance, key,
                    curr, t, block_t, n_iter, eps, min_data, pf):
    k_total, d = codebook.shape
    half = curr // 2

    # Split: perturb the existing `half` codewords into pairs.
    key, sub = jax.random.split(key)
    r = jax.random.normal(sub, (half, d), jnp.float32) * pf
    codebook = codebook.at[half:curr].set(codebook[:half] - r)
    codebook = codebook.at[:half].add(r)

    def m_step(cb, sums, counts, key):
        c_counts = counts[:curr]                              # (curr,)
        c_sums = sums[:curr]                                  # (curr, D)
        good = c_counts >= min_data
        centroids = jnp.where(good[:, None],
                              c_sums / jnp.maximum(c_counts, 1.0)[:, None],
                              c_sums)

        def repair(args):
            cent, key = args
            key, sub = jax.random.split(key)
            bad = jnp.logical_not(good)
            m = jnp.argmax(c_counts)
            rr = jax.random.normal(sub, (curr, d), jnp.float32) * pf
            n_bad = jnp.maximum(jnp.sum(bad.astype(jnp.float32)), 1.0)
            r_mean = jnp.sum(jnp.where(bad[:, None], rr, 0.0), axis=0) / n_bad
            cm = cent[m]
            cent = jnp.where(bad[:, None], cm[None, :] - rr, cent)
            cent = cent.at[m].add(r_mean)
            return cent, key

        centroids, key = lax.cond(jnp.any(jnp.logical_not(good)),
                                  repair, lambda a: a, (centroids, key))
        return cb.at[:curr].set(centroids), key

    def cond_fn(state):
        n, _, _, _, _, converged = state
        return jnp.logical_and(n < n_iter, jnp.logical_not(converged))

    def body_fn(state):
        n, _, prev, cb, key, _ = state
        # TODO(synk): for very large T that still fits VMEM, keep x resident
        # across EM iterations (per-chip cutoff: ~half on v7x's 64 MiB VMEM)
        # instead of re-streaming it from HBM each iteration.
        sc, sqd = _lbg_estep_stats(x_aug, jnp.transpose(cb),
                                   num_rows=t, block_t=block_t)
        sc = jnp.sum(sc, axis=0)                     # (K, D+1): [sums|counts]
        sums = sc[:, :d]
        counts = sc[:, d]
        dist = jnp.sum(sqd) / t
        change = jnp.abs(prev - dist)
        converged = jnp.logical_and(n > 0, change / (dist + 1e-16) < eps)
        cb, key = lax.cond(converged,
                           lambda a: a,
                           lambda a: m_step(a[0], sums, counts, a[1]),
                           (cb, key))
        return n + 1, dist, dist, cb, key, converged

    init = (jnp.int32(0), distance, distance, codebook, key, jnp.bool_(False))
    _, distance, _, codebook, key, _ = lax.while_loop(cond_fn, body_fn, init)
    return codebook, distance, key


# --------------------------------------------------------------------------
# LBG driver (mirrors the PyTorch module's forward control flow)
# --------------------------------------------------------------------------
class LindeBuzoGrayAlgorithm:
    def __init__(self, order, codebook_size, min_data_per_cluster=1,
                 n_iter=100, eps=1e-5, perturb_factor=1e-5, init="mean",
                 seed=123):
        assert order >= 0
        assert codebook_size >= 1 and (codebook_size & (codebook_size - 1)) == 0
        assert min_data_per_cluster >= 1
        assert n_iter >= 1
        assert eps >= 0
        assert perturb_factor > 0
        self.order = order
        self.codebook_size = codebook_size
        self.min_data_per_cluster = min_data_per_cluster
        self.n_iter = n_iter
        self.eps = float(eps)
        self.perturb_factor = float(perturb_factor)
        assert init == "mean"  # 'mean' initialization only (deterministic, in-script)
        self.key = jax.random.PRNGKey(seed)
        # TODO(synk): DataLoader-style batched/streaming input (and verbose
        # logging) is not modeled; a single (T, M+1) array is processed per call.

    def forward(self, x, return_indices=False):
        x = jnp.asarray(x, jnp.float32)
        assert x.ndim == 2
        t, d = x.shape
        assert d == self.order + 1
        k = self.codebook_size

        # Large lane-aligned tiles; T maps to lanes (lane-dense layout).
        block_t = min(16384, _round_up(t, 512))
        n_tiles = _cdiv(t, block_t)
        n_cores = 2 if n_tiles >= 2 else 1          # per-core output slabs (v7x)
        t_pad = _round_up(t, n_cores * block_t)

        # x stored transposed as (D+1, T_pad): features on sublanes, samples
        # on lanes; last row is ones so counts fall out of the sums matmul.
        x_aug = jnp.zeros((d + 1, t_pad), jnp.float32)
        x_aug = x_aug.at[:d, :t].set(x.T)
        x_aug = x_aug.at[d, :].set(1.0)

        # init = 'mean'
        codebook = jnp.full((k, d), 1e10, dtype=jnp.float32)
        codebook = codebook.at[0].set(jnp.sum(x, axis=0) / t)

        distance = jnp.float32(jnp.inf)
        key = self.key

        curr = 1
        while curr * 2 <= k:
            curr *= 2
            # Entire EM loop for this generation runs on device (no per-iter
            # host sync); one dispatch per codebook doubling.
            codebook, distance, key = _lbg_generation(
                x_aug, codebook, distance, key,
                curr=curr, t=t, block_t=block_t, n_iter=self.n_iter,
                eps=self.eps, min_data=self.min_data_per_cluster,
                pf=self.perturb_factor)
        self.key = key

        ret = [codebook]
        if return_indices:
            idx_pad = _lbg_estep_indices(x_aug, jnp.transpose(codebook),
                                         block_t=block_t)
            ret.append(idx_pad[0, :t])
        ret.append(distance)
        return ret

    __call__ = forward


if __name__ == "__main__":
    order = 3            # D = order + 1 = 4
    codebook_size = 8    # K
    T = 400

    key = jax.random.PRNGKey(0)
    x = jax.random.normal(key, (T, order + 1), dtype=jnp.float32)

    lbg = LindeBuzoGrayAlgorithm(order, codebook_size, n_iter=50)
    codebook, indices, distance = lbg(x, return_indices=True)

    codebook = jax.block_until_ready(codebook)
    indices = jax.block_until_ready(indices)
    distance = jax.block_until_ready(distance)

    assert codebook.shape == (codebook_size, order + 1)
    assert indices.shape == (T,)
    assert bool(jnp.all(jnp.isfinite(codebook)))
    assert bool(jnp.all((indices >= 0) & (indices < codebook_size)))
    assert bool(jnp.isfinite(distance))

    # Light correctness check: each returned index must be (near-)optimal
    # w.r.t. the returned codebook.
    d_all = jnp.sum((x[:, None, :] - codebook[None, :, :]) ** 2, axis=-1)
    chosen = d_all[jnp.arange(T), indices]
    best = jnp.min(d_all, axis=-1)
    assert bool(jnp.all(chosen <= best + 1e-3))

    print("KERNEL_OK")
</pallas_src>

<mosaic_0001>
module attributes {stable_mosaic.version = 11 : i64} {
  func.func @_estep_stats_kernel(%arg0: i32, %arg1: i32, %arg2: memref<5x512xf32, #tpu.memory_space<vmem>>, %arg3: memref<4x8xf32, #tpu.memory_space<vmem>>, %arg4: memref<1x8x5xf32, #tpu.memory_space<vmem>>, %arg5: memref<1x1x1xf32, #tpu.memory_space<vmem>>) attributes {dimension_semantics = [#tpu.dimension_semantics<parallel>, #tpu.dimension_semantics<arbitrary>], iteration_bounds = array<i64: 1, 1>, scalar_prefetch = 0 : i64, scratch_operands = 0 : i64, tpu.core_type = #tpu.core_type<tc>, window_params = [{transform_indices = @transform_0, window_bounds = array<i64: 5, 512>}, {pipeline_mode = #tpu.pipeline_mode<synchronous>, transform_indices = @transform_1, window_bounds = array<i64: 4, 8>}, {transform_indices = @transform_2, window_bounds = array<i64: 1, 8, 5>}, {transform_indices = @transform_3, window_bounds = array<i64: 1, 1, 1>}]} {
    %c0_i32 = arith.constant 0 : i32
    %0 = arith.cmpi eq, %arg1, %c0_i32 : i32
    %1 = arith.extui %0 : i1 to i32
    %c0_i32_0 = arith.constant 0 : i32
    %2 = arith.cmpi ne, %1, %c0_i32_0 : i32
    scf.if %2 {
      %cst_28 = arith.constant 0.000000e+00 : f32
      %121 = vector.broadcast %cst_28 : f32 to vector<8x5xf32>
      %c0_29 = arith.constant 0 : index
      %c0_30 = arith.constant 0 : index
      %c0_31 = arith.constant 0 : index
      %122 = vector.load %arg4[%c0_29, %c0_30, %c0_31] : memref<1x8x5xf32, #tpu.memory_space<vmem>>, vector<1x8x5xf32>
      %123 = vector.shape_cast %122 : vector<1x8x5xf32> to vector<8x5xf32>
      %124 = vector.shape_cast %121 : vector<8x5xf32> to vector<1x8x5xf32>
      tpu.vector_store %arg4[%c0_29, %c0_30, %c0_31], %124 {strides = array<i32>} : memref<1x8x5xf32, #tpu.memory_space<vmem>>, vector<1x8x5xf32>,
      %cst_32 = arith.constant 0.000000e+00 : f32
      %125 = vector.broadcast %cst_32 : f32 to vector<1x1xf32>
      %c0_33 = arith.constant 0 : index
      %c0_34 = arith.constant 0 : index
      %c0_35 = arith.constant 0 : index
      %126 = vector.load %arg5[%c0_33, %c0_34, %c0_35] : memref<1x1x1xf32, #tpu.memory_space<vmem>>, vector<1x1x1xf32>
      %127 = vector.shape_cast %126 : vector<1x1x1xf32> to vector<1x1xf32>
      %128 = vector.shape_cast %125 : vector<1x1xf32> to vector<1x1x1xf32>
      tpu.vector_store %arg5[%c0_33, %c0_34, %c0_35], %128 {strides = array<i32>} : memref<1x1x1xf32, #tpu.memory_space<vmem>>, vector<1x1x1xf32>,
    } else {
    }
    %c0 = arith.constant 0 : index
    %c0_1 = arith.constant 0 : index
    %3 = vector.load %arg3[%c0, %c0_1] : memref<4x8xf32, #tpu.memory_space<vmem>>, vector<4x8xf32>
    %c0_2 = arith.constant 0 : index
    %c0_3 = arith.constant 0 : index
    %4 = vector.load %arg2[%c0_2, %c0_3] : memref<5x512xf32, #tpu.memory_space<vmem>>, vector<5x512xf32>
    %5 = vector.extract_strided_slice %4 {offsets = [0, 0], sizes = [4, 512], strides = [1, 1]} : vector<5x512xf32> to vector<4x512xf32>
    %6 = vector.extract_strided_slice %3 {offsets = [0, 0], sizes = [4, 1], strides = [1, 1]} : vector<4x8xf32> to vector<4x1xf32>
    %7 = vector.broadcast %6 : vector<4x1xf32> to vector<4x512xf32>
    %8 = arith.subf %5, %7 : vector<4x512xf32>
    %9 = arith.mulf %8, %8 : vector<4x512xf32>
    %cst = arith.constant dense<0.000000e+00> : vector<512xf32>
    %10 = vector.multi_reduction <add>, %9, %cst [0] : vector<4x512xf32> to vector<512xf32>
    %11 = vector.shape_cast %10 : vector<512xf32> to vector<1x512xf32>
    %c0_i32_4 = arith.constant 0 : i32
    %12 = vector.broadcast %c0_i32_4 : i32 to vector<1x512xi32>
    %13 = vector.extract_strided_slice %3 {offsets = [0, 1], sizes = [4, 1], strides = [1, 1]} : vector<4x8xf32> to vector<4x1xf32>
    %14 = vector.broadcast %13 : vector<4x1xf32> to vector<4x512xf32>
    %15 = arith.subf %5, %14 : vector<4x512xf32>
    %16 = arith.mulf %15, %15 : vector<4x512xf32>
    %cst_5 = arith.constant dense<0.000000e+00> : vector<512xf32>
    %17 = vector.multi_reduction <add>, %16, %cst_5 [0] : vector<4x512xf32> to vector<512xf32>
    %18 = vector.shape_cast %17 : vector<512xf32> to vector<1x512xf32>
    %19 = arith.cmpf olt, %18, %11 : vector<1x512xf32>
    %20 = arith.select %19, %18, %11 : vector<1x512xi1>, vector<1x512xf32>
    %c1_i32 = arith.constant 1 : i32
    %21 = vector.broadcast %c1_i32 : i32 to vector<1x512xi32>
    %22 = arith.select %19, %21, %12 : vector<1x512xi1>, vector<1x512xi32>
    %23 = vector.extract_strided_slice %3 {offsets = [0, 2], sizes = [4, 1], strides = [1, 1]} : vector<4x8xf32> to vector<4x1xf32>
    %24 = vector.broadcast %23 : vector<4x1xf32> to vector<4x512xf32>
    %25 = arith.subf %5, %24 : vector<4x512xf32>
    %26 = arith.mulf %25, %25 : vector<4x512xf32>
    %cst_6 = arith.constant dense<0.000000e+00> : vector<512xf32>
    %27 = vector.multi_reduction <add>, %26, %cst_6 [0] : vector<4x512xf32> to vector<512xf32>
    %28 = vector.shape_cast %27 : vector<512xf32> to vector<1x512xf32>
    %29 = arith.cmpf olt, %28, %20 : vector<1x512xf32>
    %30 = arith.select %29, %28, %20 : vector<1x512xi1>, vector<1x512xf32>
    %c2_i32 = arith.constant 2 : i32
    %31 = vector.broadcast %c2_i32 : i32 to vector<1x512xi32>
    %32 = arith.select %29, %31, %22 : vector<1x512xi1>, vector<1x512xi32>
    %33 = vector.extract_strided_slice %3 {offsets = [0, 3], sizes = [4, 1], strides = [1, 1]} : vector<4x8xf32> to vector<4x1xf32>
    %34 = vector.broadcast %33 : vector<4x1xf32> to vector<4x512xf32>
    %35 = arith.subf %5, %34 : vector<4x512xf32>
    %36 = arith.mulf %35, %35 : vector<4x512xf32>
    %cst_7 = arith.constant dense<0.000000e+00> : vector<512xf32>
    %37 = vector.multi_reduction <add>, %36, %cst_7 [0] : vector<4x512xf32> to vector<512xf32>
    %38 = vector.shape_cast %37 : vector<512xf32> to vector<1x512xf32>
    %39 = arith.cmpf olt, %38, %30 : vector<1x512xf32>
    %40 = arith.select %39, %38, %30 : vector<1x512xi1>, vector<1x512xf32>
    %c3_i32 = arith.constant 3 : i32
    %41 = vector.broadcast %c3_i32 : i32 to vector<1x512xi32>
    %42 = arith.select %39, %41, %32 : vector<1x512xi1>, vector<1x512xi32>
    %43 = vector.extract_strided_slice %3 {offsets = [0, 4], sizes = [4, 1], strides = [1, 1]} : vector<4x8xf32> to vector<4x1xf32>
    %44 = vector.broadcast %43 : vector<4x1xf32> to vector<4x512xf32>
    %45 = arith.subf %5, %44 : vector<4x512xf32>
    %46 = arith.mulf %45, %45 : vector<4x512xf32>
    %cst_8 = arith.constant dense<0.000000e+00> : vector<512xf32>
    %47 = vector.multi_reduction <add>, %46, %cst_8 [0] : vector<4x512xf32> to vector<512xf32>
    %48 = vector.shape_cast %47 : vector<512xf32> to vector<1x512xf32>
    %49 = arith.cmpf olt, %48, %40 : vector<1x512xf32>
    %50 = arith.select %49, %48, %40 : vector<1x512xi1>, vector<1x512xf32>
    %c4_i32 = arith.constant 4 : i32
    %51 = vector.broadcast %c4_i32 : i32 to vector<1x512xi32>
    %52 = arith.select %49, %51, %42 : vector<1x512xi1>, vector<1x512xi32>
    %53 = vector.extract_strided_slice %3 {offsets = [0, 5], sizes = [4, 1], strides = [1, 1]} : vector<4x8xf32> to vector<4x1xf32>
    %54 = vector.broadcast %53 : vector<4x1xf32> to vector<4x512xf32>
    %55 = arith.subf %5, %54 : vector<4x512xf32>
    %56 = arith.mulf %55, %55 : vector<4x512xf32>
    %cst_9 = arith.constant dense<0.000000e+00> : vector<512xf32>
    %57 = vector.multi_reduction <add>, %56, %cst_9 [0] : vector<4x512xf32> to vector<512xf32>
    %58 = vector.shape_cast %57 : vector<512xf32> to vector<1x512xf32>
    %59 = arith.cmpf olt, %58, %50 : vector<1x512xf32>
    %60 = arith.select %59, %58, %50 : vector<1x512xi1>, vector<1x512xf32>
    %c5_i32 = arith.constant 5 : i32
    %61 = vector.broadcast %c5_i32 : i32 to vector<1x512xi32>
    %62 = arith.select %59, %61, %52 : vector<1x512xi1>, vector<1x512xi32>
    %63 = vector.extract_strided_slice %3 {offsets = [0, 6], sizes = [4, 1], strides = [1, 1]} : vector<4x8xf32> to vector<4x1xf32>
    %64 = vector.broadcast %63 : vector<4x1xf32> to vector<4x512xf32>
    %65 = arith.subf %5, %64 : vector<4x512xf32>
    %66 = arith.mulf %65, %65 : vector<4x512xf32>
    %cst_10 = arith.constant dense<0.000000e+00> : vector<512xf32>
    %67 = vector.multi_reduction <add>, %66, %cst_10 [0] : vector<4x512xf32> to vector<512xf32>
    %68 = vector.shape_cast %67 : vector<512xf32> to vector<1x512xf32>
    %69 = arith.cmpf olt, %68, %60 : vector<1x512xf32>
    %70 = arith.select %69, %68, %60 : vector<1x512xi1>, vector<1x512xf32>
    %c6_i32 = arith.constant 6 : i32
    %71 = vector.broadcast %c6_i32 : i32 to vector<1x512xi32>
    %72 = arith.select %69, %71, %62 : vector<1x512xi1>, vector<1x512xi32>
    %73 = vector.extract_strided_slice %3 {offsets = [0, 7], sizes = [4, 1], strides = [1, 1]} : vector<4x8xf32> to vector<4x1xf32>
    %74 = vector.broadcast %73 : vector<4x1xf32> to vector<4x512xf32>
    %75 = arith.subf %5, %74 : vector<4x512xf32>
    %76 = arith.mulf %75, %75 : vector<4x512xf32>
    %cst_11 = arith.constant dense<0.000000e+00> : vector<512xf32>
    %77 = vector.multi_reduction <add>, %76, %cst_11 [0] : vector<4x512xf32> to vector<512xf32>
    %78 = vector.shape_cast %77 : vector<512xf32> to vector<1x512xf32>
    %79 = arith.cmpf olt, %78, %70 : vector<1x512xf32>
    %80 = arith.select %79, %78, %70 : vector<1x512xi1>, vector<1x512xf32>
    %c7_i32 = arith.constant 7 : i32
    %81 = vector.broadcast %c7_i32 : i32 to vector<1x512xi32>
    %82 = arith.select %79, %81, %72 : vector<1x512xi1>, vector<1x512xi32>
    %83 = tpu.iota {dimensions = array<i32: 0>} : vector<8x512xi32>
    %84 = vector.broadcast %82 : vector<1x512xi32> to vector<8x512xi32>
    %85 = arith.cmpi eq, %83, %84 : vector<8x512xi32>
    %86 = arith.extui %85 : vector<8x512xi1> to vector<8x512xi32>
    %87 = arith.sitofp %86 : vector<8x512xi32> to vector<8x512xf32>
    %cst_12 = arith.constant 0.000000e+00 : f32
    %88 = vector.broadcast %cst_12 : f32 to vector<1x512xf32>
    %89 = arith.maximumf %80, %88 : vector<1x512xf32>
    %c1_i32_13 = arith.constant 1 : i32
    %90 = arith.muli %arg0, %c1_i32_13 : i32
    %91 = arith.addi %90, %arg1 : i32
    %c512_i32 = arith.constant 512 : i32
    %92 = arith.muli %91, %c512_i32 : i32
    %93 = tpu.iota {dimensions = array<i32: 1>} : vector<1x512xi32>
    %94 = vector.broadcast %92 : i32 to vector<1x512xi32>
    %95 = arith.addi %94, %93 : vector<1x512xi32>
    %c400_i32 = arith.constant 400 : i32
    %96 = vector.broadcast %c400_i32 : i32 to vector<1x512xi32>
    %97 = arith.cmpi slt, %95, %96 : vector<1x512xi32>
    %98 = arith.extui %97 : vector<1x512xi1> to vector<1x512xi32>
    %99 = arith.sitofp %98 : vector<1x512xi32> to vector<1x512xf32>
    %100 = vector.broadcast %99 : vector<1x512xf32> to vector<8x512xf32>
    %101 = arith.mulf %87, %100 : vector<8x512xf32>
    %102 = arith.mulf %89, %99 : vector<1x512xf32>
    %c0_14 = arith.constant 0 : index
    %c0_15 = arith.constant 0 : index
    %c0_16 = arith.constant 0 : index
    %103 = vector.load %arg4[%c0_14, %c0_15, %c0_16] : memref<1x8x5xf32, #tpu.memory_space<vmem>>, vector<1x8x5xf32>
    %104 = vector.shape_cast %103 : vector<1x8x5xf32> to vector<8x5xf32>
    %cst_17 = arith.constant dense<0.000000e+00> : vector<8x5xf32>
    %105 = tpu.matmul %101, %4, %cst_17 {dimension_numbers = #tpu.dot_dimension_numbers<[1], [1], [0], [0], [0, 0, 1, 0], [], []>} : vector<8x512xf32>, vector<5x512xf32>, vector<8x5xf32> -> vector<8x5xf32>
    %106 = arith.addf %104, %105 : vector<8x5xf32>
    %c0_18 = arith.constant 0 : index
    %c0_19 = arith.constant 0 : index
    %c0_20 = arith.constant 0 : index
    %107 = vector.load %arg4[%c0_18, %c0_19, %c0_20] : memref<1x8x5xf32, #tpu.memory_space<vmem>>, vector<1x8x5xf32>
    %108 = vector.shape_cast %107 : vector<1x8x5xf32> to vector<8x5xf32>
    %109 = vector.shape_cast %106 : vector<8x5xf32> to vector<1x8x5xf32>
    tpu.vector_store %arg4[%c0_18, %c0_19, %c0_20], %109 {strides = array<i32>} : memref<1x8x5xf32, #tpu.memory_space<vmem>>, vector<1x8x5xf32>,
    %c0_21 = arith.constant 0 : index
    %c0_22 = arith.constant 0 : index
    %c0_23 = arith.constant 0 : index
    %110 = vector.load %arg5[%c0_21, %c0_22, %c0_23] : memref<1x1x1xf32, #tpu.memory_space<vmem>>, vector<1x1x1xf32>
    %111 = vector.shape_cast %110 : vector<1x1x1xf32> to vector<1x1xf32>
    %112 = vector.shape_cast %102 : vector<1x512xf32> to vector<1x1x512xf32>
    %cst_24 = arith.constant dense<0.000000e+00> : vector<1xf32>
    %113 = vector.multi_reduction <add>, %112, %cst_24 [1, 2] : vector<1x1x512xf32> to vector<1xf32>
    %114 = vector.shape_cast %113 : vector<1xf32> to vector<1x1x1xf32>
    %115 = vector.extract %114[0, 0, 0] : f32 from vector<1x1x1xf32>
    %116 = vector.broadcast %115 : f32 to vector<1x1xf32>
    %117 = arith.addf %111, %116 : vector<1x1xf32>
    %c0_25 = arith.constant 0 : index
    %c0_26 = arith.constant 0 : index
    %c0_27 = arith.constant 0 : index
    %118 = vector.load %arg5[%c0_25, %c0_26, %c0_27] : memref<1x1x1xf32, #tpu.memory_space<vmem>>, vector<1x1x1xf32>
    %119 = vector.shape_cast %118 : vector<1x1x1xf32> to vector<1x1xf32>
    %120 = vector.shape_cast %117 : vector<1x1xf32> to vector<1x1x1xf32>
    tpu.vector_store %arg5[%c0_25, %c0_26, %c0_27], %120 {strides = array<i32>} : memref<1x1x1xf32, #tpu.memory_space<vmem>>, vector<1x1x1xf32>,
    return
  }
  func.func @transform_0(%arg0: i32, %arg1: i32) -> (i32, i32) {
    %c1_i32 = arith.constant 1 : i32
    %0 = arith.muli %arg0, %c1_i32 : i32
    %1 = arith.addi %0, %arg1 : i32
    %c0_i32 = arith.constant 0 : i32
    %c0_i32_0 = arith.constant 0 : i32
    return %c0_i32, %1 : i32, i32
  }
  func.func @transform_1(%arg0: i32, %arg1: i32) -> (i32, i32) {
    %c0_i32 = arith.constant 0 : i32
    %c0_i32_0 = arith.constant 0 : i32
    %c0_i32_1 = arith.constant 0 : i32
    return %c0_i32, %c0_i32_0 : i32, i32
  }
  func.func @transform_2(%arg0: i32, %arg1: i32) -> (i32, i32, i32) {
    %c0_i32 = arith.constant 0 : i32
    %c0_i32_0 = arith.constant 0 : i32
    %c0_i32_1 = arith.constant 0 : i32
    return %arg0, %c0_i32, %c0_i32_0 : i32, i32, i32
  }
  func.func @transform_3(%arg0: i32, %arg1: i32) -> (i32, i32, i32) {
    %c0_i32 = arith.constant 0 : i32
    %c0_i32_0 = arith.constant 0 : i32
    %c0_i32_1 = arith.constant 0 : i32
    return %arg0, %c0_i32, %c0_i32_0 : i32, i32, i32
  }
}

</mosaic_0001>

<bundles_post_ra>
// kernel: body.3
= control target key start
LH: loop header
LB: loop body
LE: loop exit
PB: predicated region body
PF: predicated region fallthrough
CT: control target
= control target key end

     0   :  { %v749_v1 = vmov 2   ;;  %v750_v2 = vmov 0   ;;  %s1068_s0 = inlined_call_operand.vmem [shape: f32[5,512], index: 0, kind: input, shape index: {}]   ;;  %s1069_s1 = inlined_call_operand.vmem [shape: f32[4,8], index: 1, kind: input, shape index: {}]   ;;  %s1070_s2 = inlined_call_operand.vmem [shape: f32[1,8,5], index: 2, kind: output, shape index: {0}]   ;;  %s1071_s3 = inlined_call_operand.hbm [shape: f32[1,1,1], index: 3, kind: output, shape index: {1}]  }
   0x1   :  { %v44_v0 = vld [vmem:[%s1069_s1] sm:$0xf]  ;;  %718 = vset.pattern.permute.xlu1 %v749_v1  ;;  %716 = vset.pattern.permute.xlu0 %v750_v2  ;;  %v787_v3 = vld [vmem:[%s1068_s0 + $0x8] sm:$0x1f]  ;;  %v792_v4 = vld [vmem:[%s1068_s0 + $0x18] sm:$0x1f] }
   0x2   :  { %144 = vperm.xlu1 %718, %v44_v0   ;;  %51 = vperm.xlu0 %716, %v44_v0   ;;  %v797_v5 = vld [vmem:[%s1068_s0] sm:$0x1f]  ;;  %v802_v6 = vld [vmem:[%s1068_s0 + $0x10] sm:$0x1f] }
   0x3   :  { %506 = vmatprep.subr.mxu0 %v787_v3  ;;  %576 = vmatprep.subr.mxu1 %v792_v4 }
   0x4   :  { %9 = vsyncpa [#allocation3], 0  ;;  %507 = vmatpush1.xpose.msra.mxu0 %v797_v5  ;;  %577 = vmatpush1.xpose.msra.mxu1 %v802_v6  ;;  %v751_v7 = vmov 3   ;;  %v752_v8 = vmov 1   ;;  %v753_v9 = vmov 4   ;;  %v754_v10 = vmov 5  }
   0x5   :  { %v755_v11 = vmov 6   ;;  %v756_v12 = vmov 7   ;;  %vm40_vm0 = vcmask 39936   ;;  %vm42_vm1 = vcmask 0   ;;  %s759_s22 = smov [#allocation2]  }
   0x6   :  { %719 = vset.pattern.permute.xlu1 %v751_v7  ;;  %717 = vset.pattern.permute.xlu0 %v752_v8  ;;  %v1072_v13 = vmov 0.0   ;;  %v455_v14 = vlaneseq  ;;  %vm62_vm2 = vcmask 1043456   ;;  %s679_s23 = sshll.u32 %s759_s22, 4  ;;  %s680_s23 = int_to_ptr.vmem [resolvable:$true] %s679_s23 }
   0x7   :  { %196 = vperm.xlu1 %719, %v44_v0   ;;  %92 = vperm.xlu0 %717, %v44_v0   ;;  %41 = vst.msk [vmem:[%s1070_s2] sm:$0xff] %vm40_vm0, %v1072_v13  ;;  %s725_s27 = scalar_lea.vmem %s680_s23, 16  ;;  %s729_s28 = scalar_lea.vmem %s680_s23, 32 }
   0x8   :  { %43 = vst.msk [vmem:[#allocation2] sm:$0x1] %vm42_vm1, %v1072_v13  ;;  %v476_v15 = vand.u32 127, %v455_v14  ;;  %v835_v7 = vshrl.u32 %v455_v14, 7  ;;  %p726_p0 = scmp.ne.s32.totalorder %s680_s23, %s725_s27  ;;  %p730_p1 = scmp.lt.s32.totalorder %s680_s23, %s680_s23 }
   0x9   :  { %p731_p2 = scmp.lt.s32.totalorder %s729_s28, %s725_s27 }
   0xa   :  { %v479_v16 = vadd.s32 384, %v476_v15 }
   0xb   :  { %720 = vset.pattern.permute.xlu1 %v753_v9  ;;  %721 = vset.pattern.permute.xlu0 %v754_v10  ;;  %p732_p3 = por %p731_p2, %p730_p1 }
   0xc   :  { %248 = vperm.xlu1 %720, %v44_v0   ;;  %300 = vperm.xlu0 %721, %v44_v0   ;;  %vm488_vm3 = vcmp.lt.s32.totalorder %v479_v16, 400 }
   0xd   :  { %p733_p4 = pnand %p732_p3, %p726_p0 }
  0x10   :  { %722 = vset.pattern.permute.xlu1 %v755_v11  ;;  %724 = vset.pattern.permute.xlu0 %v756_v12 }
  0x11   :  { %352 = vperm.xlu1 %722, %v44_v0  }
  0x15   :  { %723 = vset.pattern.permute.xlu1 %v756_v12 }
  0x16   :  { %404 = vperm.xlu1 %723, %v44_v0  }
  0x81   :  { %v145_v17 = vpop.permute.xlu1 %144  ;;  %v52_v18 = vpop.permute.xlu0 %51 }
  0x82   :  { %v147_v19 = vsub.f32 %v797_v5, %v145_v17  ;;  %v148_v20 = vsub.f32 %v787_v3, %v145_v17  ;;  %v149_v21 = vsub.f32 %v802_v6, %v145_v17  ;;  %v150_v22 = vsub.f32 %v792_v4, %v145_v17 }
  0x83   :  { %v54_v23 = vsub.f32 %v797_v5, %v52_v18  ;;  %v55_v24 = vsub.f32 %v787_v3, %v52_v18  ;;  %v56_v25 = vsub.f32 %v802_v6, %v52_v18  ;;  %v57_v26 = vsub.f32 %v792_v4, %v52_v18 }
  0x84   :  { %v151_v27 = vmul.f32 %v147_v19, %v147_v19  ;;  %v152_v28 = vmul.f32 %v148_v20, %v148_v20  ;;  %v153_v29 = vmul.f32 %v149_v21, %v149_v21  ;;  %v154_v30 = vmul.f32 %v150_v22, %v150_v22 }
  0x85   :  { %v58_v31 = vmul.f32 %v54_v23, %v54_v23  ;;  %v59_v32 = vmul.f32 %v55_v24, %v55_v24  ;;  %v60_v33 = vmul.f32 %v56_v25, %v56_v25  ;;  %v61_v34 = vmul.f32 %v57_v26, %v57_v26 }
  0x86   :  { %v155_v35 = vsel %vm62_vm2, %v151_v27, 0.0  ;;  %v162_v36 = vsel %vm62_vm2, %v152_v28, 0.0  ;;  %v169_v37 = vsel %vm62_vm2, %v153_v29, 0.0  ;;  %v176_v38 = vsel %vm62_vm2, %v154_v30, 0.0  ;;  %v197_v63 = vpop.permute.xlu1 %196  ;;  %v93_v18 = vpop.permute.xlu0 %92 }
  0x87   :  { %v156_v39 = vrot.slane %v155_v35, 4  ;;  %v163_v40 = vrot.slane %v162_v36, 4  ;;  %v170_v41 = vrot.slane %v169_v37, 4  ;;  %v177_v42 = vrot.slane %v176_v38, 4 }
  0x88   :  { %v63_v43 = vsel %vm62_vm2, %v58_v31, 0.0  ;;  %v70_v44 = vsel %vm62_vm2, %v59_v32, 0.0  ;;  %v77_v45 = vsel %vm62_vm2, %v60_v33, 0.0  ;;  %v84_v46 = vsel %vm62_vm2, %v61_v34, 0.0 }
  0x89   :  { %v157_v47 = vadd.f32 %v156_v39, %v155_v35  ;;  %v164_v48 = vadd.f32 %v163_v40, %v162_v36  ;;  %v171_v49 = vadd.f32 %v170_v41, %v169_v37  ;;  %v178_v50 = vadd.f32 %v177_v42, %v176_v38 }
  0x8a   :  { %v64_v51 = vrot.slane %v63_v43, 4  ;;  %v71_v52 = vrot.slane %v70_v44, 4  ;;  %v78_v53 = vrot.slane %v77_v45, 4  ;;  %v85_v54 = vrot.slane %v84_v46, 4 }
  0x8b   :  { %v158_v55 = vrot.slane %v157_v47, 2  ;;  %v165_v56 = vrot.slane %v164_v48, 2  ;;  %v172_v57 = vrot.slane %v171_v49, 2  ;;  %v179_v58 = vrot.slane %v178_v50, 2 }
  0x8c   :  { %v65_v59 = vadd.f32 %v64_v51, %v63_v43  ;;  %v72_v60 = vadd.f32 %v71_v52, %v70_v44  ;;  %v79_v61 = vadd.f32 %v78_v53, %v77_v45  ;;  %v86_v62 = vadd.f32 %v85_v54, %v84_v46  ;;  %v249_v54 = vpop.permute.xlu1 %248 }
  0x8d   :  { %v831_v0 = vadd.f32 %v158_v55, %v157_v47  ;;  %v833_v1 = vadd.f32 %v172_v57, %v171_v49  ;;  %v837_v12 = vadd.f32 %v165_v56, %v164_v48  ;;  %v199_v15 = vsub.f32 %v797_v5, %v197_v63 }
  0x8e   :  { %v66_v8 = vrot.slane %v65_v59, 2  ;;  %v73_v9 = vrot.slane %v72_v60, 2  ;;  %v80_v10 = vrot.slane %v79_v61, 2  ;;  %v87_v11 = vrot.slane %v86_v62, 2 }
  0x8f   :  { %v200_v17 = vsub.f32 %v787_v3, %v197_v63  ;;  %v843_v19 = vsel %vm488_vm3, 1.0, %v1072_v13  ;;  %v160_v20 = vrot.slane %v831_v0, 1  ;;  %v846_v21 = vadd.f32 %v179_v58, %v178_v50 }
  0x90   :  { %v67_v14 = vadd.f32 %v66_v8, %v65_v59  ;;  %v81_v22 = vadd.f32 %v80_v10, %v79_v61  ;;  %v201_v23 = vsub.f32 %v802_v6, %v197_v63  ;;  %v202_v24 = vsub.f32 %v792_v4, %v197_v63 }
  0x91   :  { %v203_v25 = vmul.f32 %v199_v15, %v199_v15  ;;  %v204_v26 = vmul.f32 %v200_v17, %v200_v17  ;;  %v174_v27 = vrot.slane %v833_v1, 1  ;;  %v851_v28 = vadd.f32 %v73_v9, %v72_v60 }
  0x92   :  { %v853_v29 = vadd.f32 %v87_v11, %v86_v62  ;;  %v95_v16 = vsub.f32 %v797_v5, %v93_v18  ;;  %v205_v30 = vmul.f32 %v201_v23, %v201_v23  ;;  %v206_v31 = vmul.f32 %v202_v24, %v202_v24 }
  0x93   :  { %v207_v32 = vsel %vm62_vm2, %v203_v25, 0.0  ;;  %v214_v33 = vsel %vm62_vm2, %v204_v26, 0.0  ;;  %v68_v34 = vrot.slane %v67_v14, 1  ;;  %v82_v35 = vrot.slane %v81_v22, 1 }
  0x94   :  { %v208_v36 = vrot.slane %v207_v32, 4  ;;  %v215_v37 = vrot.slane %v214_v33, 4  ;;  %v221_v38 = vsel %vm62_vm2, %v205_v30, 0.0  ;;  %v228_v39 = vsel %vm62_vm2, %v206_v31, 0.0 }
  0x95   :  { %v96_v40 = vsub.f32 %v787_v3, %v93_v18  ;;  %v97_v41 = vsub.f32 %v802_v6, %v93_v18  ;;  %v89_v42 = vrot.slane %v853_v29, 1  ;;  %v222_v44 = vrot.slane %v221_v38, 4 }
  0x96   :  { %v209_v43 = vadd.f32 %v208_v36, %v207_v32  ;;  %v229_v45 = vrot.slane %v228_v39, 4  ;;  %v98_v46 = vsub.f32 %v792_v4, %v93_v18  ;;  %v99_v47 = vmul.f32 %v95_v16, %v95_v16 }
  0x97   :  { %v100_v48 = vmul.f32 %v96_v40, %v96_v40  ;;  %v101_v49 = vmul.f32 %v97_v41, %v97_v41  ;;  %v864_v51 = vadd.f32 %v215_v37, %v214_v33  ;;  %v223_v52 = vadd.f32 %v222_v44, %v221_v38  ;;  %v301_v44 = vpop.permute.xlu0 %300 }
  0x98   :  { %v210_v50 = vrot.slane %v209_v43, 2  ;;  %v230_v53 = vadd.f32 %v229_v45, %v228_v39  ;;  %v102_v55 = vmul.f32 %v98_v46, %v98_v46  ;;  %v103_v56 = vsel %vm62_vm2, %v99_v47, 0.0 }
  0x99   :  { %v110_v57 = vsel %vm62_vm2, %v100_v48, 0.0  ;;  %v117_v58 = vsel %vm62_vm2, %v101_v49, 0.0  ;;  %v869_v59 = vadd.f32 %v68_v34, %v67_v14  ;;  %v224_v61 = vrot.slane %v223_v52, 2 }
  0x9a   :  { %v871_v60 = vadd.f32 %v210_v50, %v209_v43  ;;  %v104_v62 = vrot.slane %v103_v56, 4  ;;  %v111_v63 = vrot.slane %v110_v57, 4  ;;  %v118_v8 = vrot.slane %v117_v58, 4 }
  0x9b   :  { %v124_v9 = vsel %vm62_vm2, %v102_v55, 0.0  ;;  %v251_v10 = vsub.f32 %v797_v5, %v249_v54  ;;  %v875_v11 = vadd.f32 %v82_v35, %v81_v22  ;;  %v217_v15 = vrot.slane %v864_v51, 2 }
  0x9c   :  { %v231_v17 = vrot.slane %v230_v53, 2  ;;  %v105_v18 = vadd.f32 %v104_v62, %v103_v56  ;;  %v112_v23 = vadd.f32 %v111_v63, %v110_v57  ;;  %v119_v24 = vadd.f32 %v118_v8, %v117_v58 }
  0x9d   :  { %v125_v14 = vrot.slane %v124_v9, 4  ;;  %v252_v25 = vsub.f32 %v787_v3, %v249_v54  ;;  %v212_v26 = vrot.slane %v871_v60, 1  ;;  %v253_v30 = vsub.f32 %v802_v6, %v249_v54 }
  0x9e   :  { %v106_v16 = vrot.slane %v105_v18, 2  ;;  %v254_v31 = vsub.f32 %v792_v4, %v249_v54  ;;  %v882_v32 = vadd.f32 %v224_v61, %v223_v52  ;;  %v120_v22 = vrot.slane %v119_v24, 2 }
  0x9f   :  { %v126_v33 = vadd.f32 %v125_v14, %v124_v9  ;;  %v255_v34 = vmul.f32 %v251_v10, %v251_v10  ;;  %v256_v36 = vmul.f32 %v252_v25, %v252_v25  ;;  %v257_v37 = vmul.f32 %v253_v30, %v253_v30 }
  0xa0   :  { %v107_v35 = vadd.f32 %v106_v16, %v105_v18  ;;  %v258_v38 = vmul.f32 %v254_v31, %v254_v31  ;;  %v113_v39 = vrot.slane %v112_v23, 2  ;;  %v121_v40 = vadd.f32 %v120_v22, %v119_v24  ;;  %v353_v18 = vpop.permute.xlu1 %352 }
  0xa1   :  { %v127_v41 = vrot.slane %v126_v33, 2  ;;  %v259_v43 = vsel %vm62_vm2, %v255_v34, 0.0  ;;  %v266_v47 = vsel %vm62_vm2, %v256_v36, 0.0  ;;  %v273_v48 = vsel %vm62_vm2, %v257_v37, 0.0 }
  0xa2   :  { %v108_v45 = vrot.slane %v107_v35, 1  ;;  %v260_v46 = vrot.slane %v259_v43, 4  ;;  %v887_v49 = vadd.f32 %v231_v17, %v230_v53  ;;  %v122_v50 = vrot.slane %v121_v40, 1 }
  0xa3   :  { %v267_v52 = vrot.slane %v266_v47, 4  ;;  %v274_v54 = vrot.slane %v273_v48, 4  ;;  %v889_v55 = vadd.f32 %v127_v41, %v126_v33  ;;  %v280_v57 = vsel %vm62_vm2, %v258_v38, 0.0 }
  0xa4   :  { %v261_v56 = vadd.f32 %v260_v46, %v259_v43  ;;  %v303_v58 = vsub.f32 %v797_v5, %v301_v44  ;;  %v226_v61 = vrot.slane %v882_v32, 1  ;;  %v894_v62 = vadd.f32 %v113_v39, %v112_v23 }
  0xa5   :  { %v896_v63 = vadd.f32 %v267_v52, %v266_v47  ;;  %v275_v8 = vadd.f32 %v274_v54, %v273_v48  ;;  %v898_v9 = vadd.f32 %v108_v45, %v107_v35  ;;  %v304_v10 = vsub.f32 %v787_v3, %v301_v44  ;;  %v405_v52 = vpop.permute.xlu1 %404 }
  0xa6   :  { %v262_v53 = vrot.slane %v261_v56, 2  ;;  %v305_v17 = vsub.f32 %v802_v6, %v301_v44  ;;  %v902_v24 = vadd.f32 %v122_v50, %v121_v40  ;;  %v281_v14 = vrot.slane %v280_v57, 4 }
  0xa7   :  { %v306_v25 = vsub.f32 %v792_v4, %v301_v44  ;;  %v307_v16 = vmul.f32 %v303_v58, %v303_v58  ;;  %v129_v23 = vrot.slane %v889_v55, 1  ;;  %v269_v30 = vrot.slane %v896_v63, 2 }
  0xa8   :  { %v308_v31 = vmul.f32 %v304_v10, %v304_v10  ;;  %v309_v22 = vmul.f32 %v305_v17, %v305_v17  ;;  %v276_v33 = vrot.slane %v275_v8, 2  ;;  %v355_v36 = vsub.f32 %v797_v5, %v353_v18 }
  0xa9   :  { %v310_v34 = vmul.f32 %v306_v25, %v306_v25  ;;  %v311_v35 = vsel %vm62_vm2, %v307_v16, 0.0  ;;  %v909_v37 = vadd.f32 %v262_v53, %v261_v56  ;;  %v913_v41 = vadd.f32 %v281_v14, %v280_v57 }
  0xaa   :  { %v312_v38 = vrot.slane %v311_v35, 4  ;;  %v318_v39 = vsel %vm62_vm2, %v308_v31, 0.0  ;;  %v325_v40 = vsel %vm62_vm2, %v309_v22, 0.0  ;;  %v356_v45 = vsub.f32 %v787_v3, %v353_v18 }
  0xab   :  { %v326_v43 = vrot.slane %v325_v40, 4  ;;  %v332_v44 = vsel %vm62_vm2, %v310_v34, 0.0  ;;  %v357_v48 = vsub.f32 %v802_v6, %v353_v18  ;;  %v358_v50 = vsub.f32 %v792_v4, %v353_v18 }
  0xac   :  { %v313_v46 = vadd.f32 %v312_v38, %v311_v35  ;;  %v333_v47 = vrot.slane %v332_v44, 4  ;;  %v319_v54 = vrot.slane %v318_v39, 4  ;;  %v359_v58 = vmul.f32 %v355_v36, %v355_v36 }
  0xad   :  { %v327_v56 = vadd.f32 %v326_v43, %v325_v40  ;;  %v360_v53 = vmul.f32 %v356_v45, %v356_v45  ;;  %v361_v57 = vmul.f32 %v357_v48, %v357_v48  ;;  %v362_v14 = vmul.f32 %v358_v50, %v358_v50 }
  0xae   :  { %v314_v10 = vrot.slane %v313_v46, 2  ;;  %v919_v17 = vadd.f32 %v333_v47, %v332_v44  ;;  %v921_v25 = vadd.f32 %v276_v33, %v275_v8  ;;  %v363_v16 = vsel %vm62_vm2, %v359_v58, 0.0 }
  0xaf   :  { %v370_v31 = vsel %vm62_vm2, %v360_v53, 0.0  ;;  %v407_v22 = vsub.f32 %v797_v5, %v405_v52  ;;  %v283_v18 = vrot.slane %v913_v41, 2  ;;  %v328_v34 = vrot.slane %v327_v56, 2 }
  0xb0   :  { %v364_v35 = vrot.slane %v363_v16, 4  ;;  %v371_v38 = vrot.slane %v370_v31, 4  ;;  %v320_v36 = vadd.f32 %v319_v54, %v318_v39  ;;  %v377_v40 = vsel %vm62_vm2, %v361_v57, 0.0 }
  0xb1   :  { %v384_v43 = vsel %vm62_vm2, %v362_v14, 0.0  ;;  %v408_v44 = vsub.f32 %v787_v3, %v405_v52  ;;  %v930_v8 = vadd.f32 %v314_v10, %v313_v46  ;;  %v335_v33 = vrot.slane %v919_v17, 2 }
  0xb2   :  { %v933_v45 = vadd.f32 %v364_v35, %v363_v16  ;;  %v378_v47 = vrot.slane %v377_v40, 4  ;;  %v409_v5 = vsub.f32 %v802_v6, %v405_v52  ;;  %v410_v48 = vsub.f32 %v792_v4, %v405_v52 }
  0xb3   :  { %v411_v50 = vmul.f32 %v407_v22, %v407_v22  ;;  %v412_v58 = vmul.f32 %v408_v44, %v408_v44  ;;  %v937_v39 = vadd.f32 %v328_v34, %v327_v56  ;;  %v372_v54 = vadd.f32 %v371_v38, %v370_v31 }
  0xb4   :  { %v385_v53 = vrot.slane %v384_v43, 4  ;;  %v75_v57 = vrot.slane %v851_v28, 1  ;;  %v413_v3 = vmul.f32 %v409_v5, %v409_v5  ;;  %v414_v46 = vmul.f32 %v410_v48, %v410_v48 }
  0xb5   :  { %v415_v10 = vsel %vm62_vm2, %v411_v50, 0.0  ;;  %v422_v14 = vsel %vm62_vm2, %v412_v58, 0.0  ;;  %v366_v16 = vrot.slane %v933_v45, 2  ;;  %v943_v35 = vadd.f32 %v378_v47, %v377_v40 }
  0xb6   :  { %v416_v6 = vrot.slane %v415_v10, 4  ;;  %v423_v4 = vrot.slane %v422_v14, 4  ;;  %v429_v52 = vsel %vm62_vm2, %v413_v3, 0.0  ;;  %v436_v56 = vsel %vm62_vm2, %v414_v46, 0.0 }
  0xb7   :  { %v115_v31 = vrot.slane %v894_v62, 1  ;;  %v167_v22 = vrot.slane %v837_v12, 1  ;;  %v949_v34 = vadd.f32 %v385_v53, %v384_v43  ;;  %v430_v44 = vrot.slane %v429_v52, 4 }
  0xb8   :  { %v417_v38 = vadd.f32 %v416_v6, %v415_v10  ;;  %v437_v5 = vrot.slane %v436_v56, 4  ;;  %v76_v48 = vadd.f32 %v75_v57, %v851_v28  ;;  %v218_v47 = vadd.f32 %v217_v15, %v864_v51 }
  0xb9   :  { %v116_v40 = vadd.f32 %v115_v31, %v894_v62  ;;  %v270_v50 = vadd.f32 %v269_v30, %v896_v63  ;;  %v424_v3 = vadd.f32 %v423_v4, %v422_v14  ;;  %v168_v43 = vadd.f32 %v167_v22, %v837_v12 }
  0xba   :  { %v418_v58 = vrot.slane %v417_v38, 2  ;;  %v321_v53 = vrot.slane %v320_v36, 2  ;;  %v219_v46 = vrot.slane %v218_v47, 1  ;;  %v373_v6 = vrot.slane %v372_v54, 2 }
  0xbb   :  { %vm132_vm4 = vcmp.lt.f32.partialorder %v116_v40, %v76_v48  ;;  %v271_v10 = vrot.slane %v270_v50, 1  ;;  %v380_v28 = vrot.slane %v943_v35, 2  ;;  %v961_v62 = vadd.f32 %v430_v44, %v429_v52 }
  0xbc   :  { %v963_v57 = vadd.f32 %v437_v5, %v436_v56  ;;  %v136_v51 = vsel %vm132_vm4, %v116_v40, %v76_v48  ;;  %v140_v15 = vsel %vm132_vm4, 1, %v750_v2  ;;  %v220_v63 = vadd.f32 %v219_v46, %v218_v47 }
  0xbd   :  { %vm184_vm5 = vcmp.lt.f32.partialorder %v168_v43, %v136_v51  ;;  %v272_v30 = vadd.f32 %v271_v10, %v270_v50  ;;  %v966_v14 = vadd.f32 %v418_v58, %v417_v38  ;;  %v322_v31 = vadd.f32 %v321_v53, %v320_v36 }
  0xbe   :  { %v188_v12 = vsel %vm184_vm5, %v168_v43, %v136_v51  ;;  %v192_v4 = vsel %vm184_vm5, 2, %v140_v15  ;;  %v374_v22 = vadd.f32 %v373_v6, %v372_v54  ;;  %v425_v13 = vrot.slane %v424_v3, 2 }
  0xbf   :  { %vm236_vm6 = vcmp.lt.f32.partialorder %v220_v63, %v188_v12  ;;  %vm131_vm7 = vcmp.lt.f32.partialorder %v898_v9, %v869_v59  ;;  %v323_v44 = vrot.slane %v322_v31, 1  ;;  %v161_v54 = vadd.f32 %v160_v20, %v831_v0 }
  0xc0   :  { %v240_v52 = vsel %vm236_vm6, %v220_v63, %v188_v12  ;;  %v244_v56 = vsel %vm236_vm6, 3, %v192_v4  ;;  %v135_v5 = vsel %vm131_vm7, %v898_v9, %v869_v59  ;;  %v375_v48 = vrot.slane %v374_v22, 1 }
  0xc1   :  { %vm288_vm8 = vcmp.lt.f32.partialorder %v272_v30, %v240_v52  ;;  %v426_v40 = vadd.f32 %v425_v13, %v424_v3  ;;  %v139_v38 = vsel %vm131_vm7, 1, %v750_v2  ;;  %v324_v36 = vadd.f32 %v323_v44, %v322_v31 }
  0xc2   :  { %v292_v47 = vsel %vm288_vm8, %v272_v30, %v240_v52  ;;  %v296_v50 = vsel %vm288_vm8, 4, %v244_v56  ;;  %v376_v58 = vadd.f32 %v375_v48, %v374_v22  ;;  %v213_v53 = vadd.f32 %v212_v26, %v871_v60 }
  0xc3   :  { %v427_v43 = vrot.slane %v426_v40, 1  ;;  %v264_v59 = vrot.slane %v909_v37, 1  ;;  %vm340_vm9 = vcmp.lt.f32.partialorder %v324_v36, %v292_v47  ;;  %vm183_vm10 = vcmp.lt.f32.partialorder %v161_v54, %v135_v5 }
  0xc4   :  { %v316_v13 = vrot.slane %v930_v8, 1  ;;  %v367_v9 = vadd.f32 %v366_v16, %v933_v45  ;;  %v344_v3 = vsel %vm340_vm9, %v324_v36, %v292_v47  ;;  %v348_v46 = vsel %vm340_vm9, 5, %v296_v50 }
  0xc5   :  { %v428_v10 = vadd.f32 %v427_v43, %v426_v40  ;;  %v187_v6 = vsel %vm183_vm10, %v161_v54, %v135_v5  ;;  %vm392_vm11 = vcmp.lt.f32.partialorder %v376_v58, %v344_v3  ;;  %v191_v0 = vsel %vm183_vm10, 2, %v139_v38 }
  0xc6   :  { %vm235_vm12 = vcmp.lt.f32.partialorder %v213_v53, %v187_v6  ;;  %v265_v20 = vadd.f32 %v264_v59, %v909_v37  ;;  %v396_v51 = vsel %vm392_vm11, %v376_v58, %v344_v3  ;;  %v400_v15 = vsel %vm392_vm11, 6, %v348_v46 }
  0xc7   :  { %v239_v60 = vsel %vm235_vm12, %v213_v53, %v187_v6  ;;  %v243_v26 = vsel %vm235_vm12, 3, %v191_v0  ;;  %vm444_vm13 = vcmp.lt.f32.partialorder %v428_v10, %v396_v51  ;;  %v317_v63 = vadd.f32 %v316_v13, %v930_v8 }
  0xc8   :  { %vm287_vm14 = vcmp.lt.f32.partialorder %v265_v20, %v239_v60  ;;  %v368_v30 = vrot.slane %v367_v9, 1  ;;  %v432_v45 = vrot.slane %v961_v62, 2  ;;  %v452_v16 = vsel %vm444_vm13, 7, %v400_v15 }
  0xc9   :  { %v291_v12 = vsel %vm287_vm14, %v265_v20, %v239_v60  ;;  %v295_v4 = vsel %vm287_vm14, 4, %v243_v26  ;;  %v439_v31 = vrot.slane %v963_v57, 2  ;;  %vm458_vm15 = vcmp.eq.s32.totalorder %v835_v7, %v452_v16 }
  0xca   :  { %vm339_vm2 = vcmp.lt.f32.partialorder %v317_v63, %v291_v12  ;;  %v369_v37 = vadd.f32 %v368_v30, %v367_v9  ;;  %v758_v22 = vmov 1.0   ;;  %v420_v8 = vrot.slane %v966_v14, 1 }
  0xcb   :  { %700 = vmatprep.mubr.msk.f32.mxu0 %vm458_vm15, %v758_v22  ;;  %v343_v52 = vsel %vm339_vm2, %v317_v63, %v291_v12  ;;  %v347_v56 = vsel %vm339_vm2, 5, %v295_v4  ;;  %v90_v44 = vadd.f32 %v89_v42, %v853_v29  ;;  %v130_v5 = vadd.f32 %v129_v23, %v889_v55 }
  0xcc   :  { %vm391_vm3 = vcmp.lt.f32.partialorder %v369_v37, %v343_v52  ;;  %v181_v48 = vrot.slane %v846_v21, 1  ;;  %v233_v40 = vrot.slane %v887_v49, 1  ;;  %v999_v38 = vsel %vm444_vm13, %v428_v10, %v396_v51 }
  0xcd   :  { %v395_v47 = vsel %vm391_vm3, %v369_v37, %v343_v52  ;;  %v421_v50 = vadd.f32 %v420_v8, %v966_v14  ;;  %v284_v36 = vadd.f32 %v283_v18, %v913_v41  ;;  %v399_v29 = vsel %vm391_vm3, 6, %v347_v56 }
  0xce   :  { %vm134_vm4 = vcmp.lt.f32.partialorder %v130_v5, %v90_v44  ;;  %v182_v42 = vadd.f32 %v181_v48, %v846_v21  ;;  %v336_v55 = vadd.f32 %v335_v33, %v919_v17  ;;  %v234_v14 = vadd.f32 %v233_v40, %v887_v49 }
  0xcf   :  { %vm443_vm5 = vcmp.lt.f32.partialorder %v421_v50, %v395_v47  ;;  %v138_v23 = vsel %vm134_vm4, %v130_v5, %v90_v44  ;;  %v142_v54 = vsel %vm134_vm4, 1, %v750_v2  ;;  %v285_v58 = vrot.slane %v284_v36, 1 }
  0xd0   :  { %v451_v43 = vsel %vm443_vm5, 7, %v399_v29  ;;  %vm186_vm6 = vcmp.lt.f32.partialorder %v182_v42, %v138_v23  ;;  %v337_v53 = vrot.slane %v336_v55, 1  ;;  %v433_v41 = vadd.f32 %v432_v45, %v961_v62 }
  0xd1   :  { %vm457_vm7 = vcmp.eq.s32.totalorder %v835_v7, %v451_v43  ;;  %v190_v21 = vsel %vm186_vm6, %v182_v42, %v138_v23  ;;  %v194_v18 = vsel %vm186_vm6, 2, %v142_v54  ;;  %v470_v59 = vmax.f32 %v999_v38, 0.0 }
  0xd2   :  { %701 = vmatmul.mubr.msk.f32.vlgmr.msra.gmra.mrb[0].mxu0 %vm457_vm7, %v758_v22  ;;  %vm238_vm8 = vcmp.lt.f32.partialorder %v234_v14, %v190_v21  ;;  %v286_v17 = vadd.f32 %v285_v58, %v284_v36  ;;  %v387_v33 = vrot.slane %v949_v34, 2  ;;  %v440_v3 = vadd.f32 %v439_v31, %v963_v57 }
  0xd3   :  { %v242_v13 = vsel %vm238_vm8, %v234_v14, %v190_v21  ;;  %v246_v9 = vsel %vm238_vm8, 3, %v194_v18  ;;  %vm133_vm9 = vcmp.lt.f32.partialorder %v902_v24, %v875_v11  ;;  %v338_v49 = vadd.f32 %v337_v53, %v336_v55 }
  0xd4   :  { %vm290_vm10 = vcmp.lt.f32.partialorder %v286_v17, %v242_v13  ;;  %v388_v62 = vadd.f32 %v387_v33, %v949_v34  ;;  %v137_v46 = vsel %vm133_vm9, %v902_v24, %v875_v11  ;;  %v441_v6 = vrot.slane %v440_v3, 1 }
  0xd5   :  { %v294_v10 = vsel %vm290_vm10, %v286_v17, %v242_v13  ;;  %v141_v0 = vsel %vm133_vm9, 1, %v750_v2  ;;  %v175_v20 = vadd.f32 %v174_v27, %v833_v1  ;;  %v298_v51 = vsel %vm290_vm10, 4, %v246_v9 }
  0xd6   :  { %vm342_vm11 = vcmp.lt.f32.partialorder %v338_v49, %v294_v10  ;;  %v389_v57 = vrot.slane %v388_v62, 1  ;;  %v278_v15 = vrot.slane %v921_v25, 1  ;;  %v442_v26 = vadd.f32 %v441_v6, %v440_v3 }
  0xd7   :  { %v346_v60 = vsel %vm342_vm11, %v338_v49, %v294_v10  ;;  %vm185_vm12 = vcmp.lt.f32.partialorder %v175_v20, %v137_v46  ;;  %v227_v11 = vadd.f32 %v226_v61, %v882_v32  ;;  %v350_v30 = vsel %vm342_vm11, 5, %v298_v51  ;;  %v649_v49 = vld [vmem:[#allocation2] sm:$0x1] }
  0xd8   :  { %v390_v24 = vadd.f32 %v389_v57, %v388_v62  ;;  %v189_v34 = vsel %vm185_vm12, %v175_v20, %v137_v46  ;;  %v193_v63 = vsel %vm185_vm12, 2, %v141_v0  ;;  %v279_v2 = vadd.f32 %v278_v15, %v921_v25  ;;  %v505_v46 = vld [vmem:[%s1070_s2] sm:$0xff] }
  0xd9   :  { %vm237_vm13 = vcmp.lt.f32.partialorder %v227_v11, %v189_v34  ;;  %v330_v1 = vrot.slane %v937_v39, 1  ;;  %v381_v27 = vadd.f32 %v380_v28, %v943_v35  ;;  %v447_v45 = vsel %vm443_vm5, %v421_v50, %v395_v47 }
  0xda   :  { %vm394_vm14 = vcmp.lt.f32.partialorder %v390_v24, %v346_v60  ;;  %v241_v16 = vsel %vm237_vm13, %v227_v11, %v189_v34  ;;  %v245_v12 = vsel %vm237_vm13, 3, %v193_v63  ;;  %v434_v61 = vrot.slane %v433_v41, 1 }
  0xdb   :  { %v398_v4 = vsel %vm394_vm14, %v390_v24, %v346_v60  ;;  %vm289_vm15 = vcmp.lt.f32.partialorder %v279_v2, %v241_v16  ;;  %v331_v32 = vadd.f32 %v330_v1, %v937_v39  ;;  %v402_v31 = vsel %vm394_vm14, 6, %v350_v30 }
  0xdc   :  { %vm446_vm2 = vcmp.lt.f32.partialorder %v442_v26, %v398_v4  ;;  %v293_v25 = vsel %vm289_vm15, %v279_v2, %v241_v16  ;;  %v382_v37 = vrot.slane %v381_v27, 1  ;;  %v469_v52 = vmax.f32 %v447_v45, 0.0 }
  0xdd   :  { %v454_v56 = vsel %vm446_vm2, 7, %v402_v31  ;;  %v297_v8 = vsel %vm289_vm15, 4, %v245_v12  ;;  %vm341_vm3 = vcmp.lt.f32.partialorder %v331_v32, %v293_v25  ;;  %v450_v44 = vsel %vm446_vm2, %v442_v26, %v398_v4 }
  0xde   :  { %vm460_vm4 = vcmp.eq.s32.totalorder %v835_v7, %v454_v56  ;;  %v345_v35 = vsel %vm341_vm3, %v331_v32, %v293_v25  ;;  %vm650_vm5 = vcmask 1040384   ;;  %v1073_v28 = vmov 0.0  }
  0xdf   :  { %v698_v5 = vsel %vm460_vm4, 1.0, %v1073_v28  ;;  %v383_v48 = vadd.f32 %v382_v37, %v381_v27  ;;  %v435_v40 = vadd.f32 %v434_v61, %v433_v41  ;;  %v349_v38 = vsel %vm341_vm3, 5, %v297_v8 }
  0xe0   :  { %v500_v39 = vmul.f32 %v843_v19, %v698_v5  ;;  %v472_v47 = vmax.f32 %v450_v44, 0.0  ;;  %v651_v50 = vsel %vm650_vm5, %v469_v52, 0.0  ;;  %v652_v36 = vsel %vm650_vm5, %v470_v59, 0.0 }
  0xe1   :  { %vm393_vm6 = vcmp.lt.f32.partialorder %v383_v48, %v345_v35  ;;  %v653_v54 = vadd.f32 %v652_v36, %v651_v50 }
  0xe2   :  { %640 = vmatprep.mubr.f32.mxu1 %v500_v39  ;;  %v397_v29 = vsel %vm393_vm6, %v383_v48, %v345_v35  ;;  %v401_v42 = vsel %vm393_vm6, 6, %v349_v38  ;;  %v504_v58 = vmul.f32 %v843_v19, %v472_v47 }
  0xe3   :  { %vm445_vm7 = vcmp.lt.f32.partialorder %v435_v40, %v397_v29 }
  0xe4   :  { %v453_v55 = vsel %vm445_vm7, 7, %v401_v42  ;;  %v449_v23 = vsel %vm445_vm7, %v435_v40, %v397_v29  ;;  %v656_v41 = vsel %vm650_vm5, %v504_v58, 0.0 }
  0xe5   :  { %vm459_vm8 = vcmp.eq.s32.totalorder %v835_v7, %v453_v55  ;;  %v471_v43 = vmax.f32 %v449_v23, 0.0 }
  0xe6   :  { %702 = vmatmul.mubr.msk.f32.vlgmr.msra.gmra.mrb[0].mxu1 %vm459_vm8, %v758_v22 }
  0xe7   :  { %v654_v14 = vsel %vm650_vm5, %v471_v43, 0.0 }
  0xe8   :  { %v655_v53 = vadd.f32 %v654_v14, %v653_v54 }
  0xea   :  { %v657_v21 = vadd.f32 %v656_v41, %v655_v53 }
  0xec   :  { %658 = vadd.xlane.f32.xlu0 %v657_v21 }
 0x179   :  { %v659_v18 = vpop.xlane.xlu0 %658 }
 0x17a   :  { %v660_v59 = vrot.slane %v659_v18, 4 }
 0x17c   :  { %v661_v17 = vadd.f32 %v660_v59, %v659_v18 }
 0x17e   :  { %v662_v33 = vrot.slane %v661_v17, 2 }
 0x180   :  { %v663_v13 = vadd.f32 %v662_v33, %v661_v17 }
 0x182   :  { %v664_v9 = vrot.slane %v663_v13, 1 }
 0x184   :  { %v665_v3 = vadd.f32 %v664_v9, %v663_v13 }
 0x186   :  { %703 = vpush %v665_v3 }
 0x1a5   :  { %v572_v19 = vpop.f32.mrb[0].mxu0 }
 0x1a6   :  { %v574_v7 = vpop.f32.mrb[1].mxu0 }
 0x1b7   :  { %s704_s24 = spop %703 }
 0x1b8   :  { %v667_v22 = vstv %s704_s24 }
 0x1b9   :  { %v668_v62 = vadd.f32 %v667_v22, %v649_v49  ;;  %v642_v10 = vpop.f32.mrb[0].mxu1 }
 0x1ba   :  { %v643_v6 = vadd.f32 %v642_v10, %v572_v19  ;;  %v644_v0 = vpop.f32.mrb[1].mxu1 }
 0x1bb   :  { %670 = vst.msk [vmem:[#allocation2] sm:$0x1] %vm42_vm1, %v668_v62 }
 0x1bc   :  { %v646_v20 = vadd.f32 %v643_v6, %v505_v46 }
 0x1bd   :  { %736 = shalt.err (!%p733_p4)
}
 0x1be   :  { %s737_s4 = scalar_lea.hbm %s1071_s3, 16 }
 0x1bf   :  { %p738_p5 = scmp.ne.s32.totalorder %s1071_s3, %s737_s4  ;;  %p741_p6 = scmp.lt.u32.totalorder %s737_s4, %s1071_s3 }
 0x1c1   :  { %p743_p7 = pnand %p741_p6, %p738_p5 }
 0x1c3   :  { %746 = shalt.err (!%p743_p7)
}
 0x1c4   :  { %682 = dma.vmem_to_hbm [thread:$0]  %s680_s23, 16, %s1071_s3, [#allocation3]   ;;  %648 = vst.msk [vmem:[%s1070_s2] sm:$0xff] %vm40_vm0, %v646_v20 }
 0x1c5   :  { %747 = dma.done.wait [#allocation3], 16  }
 0x1c6   :  { %748 = vsyncadd [#allocation3], 4294967280 }
 0x1c7   :  { %688 = vsyncpa [#allocation3], 1 }

</bundles_post_ra>
